<compile_context>
chip_gen: v5e
topology: v5e:2x2
jax: 0.10.0
libtpu: 0.0.40
codegen_flags: <defaults>
</compile_context>

<pallas_src>
import jax
import jax.numpy as jnp
from jax import lax
from jax.experimental import pallas as pl
from jax.experimental.pallas import tpu as pltpu


def _round_up(n: int, m: int) -> int:
    return ((n + m - 1) // m) * m


def _logreg_kernel(x_ref, w_ref, b_ref, o_ref, acc_ref):
    # x_ref: (tm, tk) bf16   w_ref: (tn, tk) bf16   b_ref: (1, tn) f32
    # o_ref: (tm, tn) f32    acc_ref: (tm, tn) f32 scratch (resident across K)
    k = pl.program_id(2)

    @pl.when(k == 0)
    def _init():
        acc_ref[...] = jnp.zeros_like(acc_ref)

    # Contract last dim of x with last dim of w ( == x @ w.T ), f32 accumulate.
    acc_ref[...] += lax.dot_general(
        x_ref[...],
        w_ref[...],
        dimension_numbers=(((1,), (1,)), ((), ())),
        preferred_element_type=jnp.float32,
    )

    @pl.when(k == pl.num_programs(2) - 1)
    def _finalize():
        z = acc_ref[...] + b_ref[...]              # f32 bias add (VPU)
        e = jnp.exp(-z)                            # EUP
        o_ref[...] = (1.0 / (1.0 + e)).astype(o_ref.dtype)   # exact sigmoid


def logistic_regression(x, weight, bias, *, tm=256, tn=128, tk=512,
                        mxu_dtype=jnp.bfloat16):
    """x: [B, In], weight: [Out, In] (PyTorch nn.Linear layout), bias: [Out]."""
    B, In = x.shape
    Out, In_w = weight.shape
    assert In_w == In and bias.shape == (Out,)

    # Clamp tiles to the (aligned) problem size; keep tn a multiple of 128 so
    # the output stays lane-dense, tm a multiple of 8, tk a multiple of 128.
    tm = min(tm, _round_up(B, 8))
    tn = min(tn, _round_up(Out, 128))
    tk = min(tk, _round_up(In, 128))

    B_p = _round_up(B, tm)
    Out_p = _round_up(Out, tn)
    In_p = _round_up(In, tk)

    # Zero-pad (padding along K contributes 0 to the dot product) and cast the
    # MXU operands once in the wrapper; bias / epilogue stay f32.
    x_p = jnp.pad(x, ((0, B_p - B), (0, In_p - In))).astype(mxu_dtype)
    w_p = jnp.pad(weight, ((0, Out_p - Out), (0, In_p - In))).astype(mxu_dtype)
    b_p = jnp.pad(bias, (0, Out_p - Out)).reshape(1, Out_p).astype(jnp.float32)

    grid = (B_p // tm, Out_p // tn, In_p // tk)

    out_p = pl.pallas_call(
        _logreg_kernel,
        out_shape=jax.ShapeDtypeStruct((B_p, Out_p), jnp.float32),
        grid_spec=pltpu.PrefetchScalarGridSpec(
            num_scalar_prefetch=0,
            grid=grid,
            in_specs=[
                pl.BlockSpec((tm, tk), lambda i, j, k: (i, k)),   # x tile
                pl.BlockSpec((tn, tk), lambda i, j, k: (j, k)),   # weight tile (no transpose)
                pl.BlockSpec((1, tn), lambda i, j, k: (0, j)),    # per-N-tile bias
            ],
            out_specs=pl.BlockSpec((tm, tn), lambda i, j, k: (i, j)),
            scratch_shapes=[pltpu.VMEM((tm, tn), jnp.float32)],
        ),
        compiler_params=pltpu.CompilerParams(
            dimension_semantics=("parallel", "parallel", "arbitrary"),
            vmem_limit_bytes=48 * 1024 * 1024,   # fits v5e/v6e (128 MiB) and v7x (64 MiB)
        ),
    )(x_p, w_p, b_p)

    return out_p[:B, :Out]


if __name__ == "__main__":
    # Small shapes consistent with the module: input_size=32, output_size=16, batch=8
    # NOTE: at these toy shapes a fused XLA op would beat any custom kernel; the
    # tiling above is written for real (large B/In/Out) shapes.
    batch, input_size, output_size = 8, 32, 16

    key = jax.random.PRNGKey(0)
    kx, kw, kb = jax.random.split(key, 3)

    # Deterministic param init mimicking nn.Linear default: U(-1/sqrt(in), 1/sqrt(in))
    bound = 1.0 / jnp.sqrt(jnp.float32(input_size))
    weight = jax.random.uniform(kw, (output_size, input_size), jnp.float32,
                                minval=-bound, maxval=bound)
    bias = jax.random.uniform(kb, (output_size,), jnp.float32,
                              minval=-bound, maxval=bound)
    x = jax.random.normal(kx, (batch, input_size), jnp.float32)

    out = logistic_regression(x, weight, bias)
    out = jax.block_until_ready(out)
    assert out.shape == (batch, output_size)

    # Reference consistent with the kernel's bf16 MXU operands + f32 accumulation.
    z_bf16 = jnp.dot(x.astype(jnp.bfloat16), weight.astype(jnp.bfloat16).T,
                     preferred_element_type=jnp.float32) + bias
    ref_bf16 = jax.nn.sigmoid(z_bf16)
    assert jnp.allclose(out, ref_bf16, atol=2e-3, rtol=2e-3), \
        float(jnp.max(jnp.abs(out - ref_bf16)))

    # Sanity check against the full-f32 PyTorch-equivalent forward.
    ref_f32 = jax.nn.sigmoid(x @ weight.T + bias)
    assert jnp.allclose(out, ref_f32, atol=2e-2, rtol=2e-2), \
        float(jnp.max(jnp.abs(out - ref_f32)))

    print("KERNEL_OK")
</pallas_src>

<mosaic_0001>
module attributes {stable_mosaic.version = 11 : i64} {
  func.func @_logreg_kernel(%arg0: i32, %arg1: i32, %arg2: i32, %arg3: memref<8x128xbf16, #tpu.memory_space<vmem>>, %arg4: memref<128x128xbf16, #tpu.memory_space<vmem>>, %arg5: memref<1x128xf32, #tpu.memory_space<vmem>>, %arg6: memref<8x128xf32, #tpu.memory_space<vmem>>, %arg7: memref<8x128xf32, #tpu.memory_space<vmem>>) attributes {dimension_semantics = [#tpu.dimension_semantics<parallel>, #tpu.dimension_semantics<parallel>, #tpu.dimension_semantics<arbitrary>], iteration_bounds = array<i64: 1, 1, 1>, scalar_prefetch = 0 : i64, scratch_operands = 1 : i64, tpu.core_type = #tpu.core_type<tc>, window_params = [{transform_indices = @transform_0, window_bounds = array<i64: 8, 128>}, {transform_indices = @transform_1, window_bounds = array<i64: 128, 128>}, {transform_indices = @transform_2, window_bounds = array<i64: 1, 128>}, {transform_indices = @transform_3, window_bounds = array<i64: 8, 128>}]} {
    %c0_i32 = arith.constant 0 : i32
    %0 = arith.cmpi eq, %arg2, %c0_i32 : i32
    %1 = arith.extui %0 : i1 to i32
    %c0_i32_0 = arith.constant 0 : i32
    %2 = arith.cmpi ne, %1, %c0_i32_0 : i32
    scf.if %2 {
      %cst_10 = arith.constant 0.000000e+00 : f32
      %12 = vector.broadcast %cst_10 : f32 to vector<8x128xf32>
      %c0_11 = arith.constant 0 : index
      %c0_12 = arith.constant 0 : index
      %13 = vector.load %arg7[%c0_11, %c0_12] : memref<8x128xf32, #tpu.memory_space<vmem>>, vector<8x128xf32>
      tpu.vector_store %arg7[%c0_11, %c0_12], %12 {strides = array<i32>} : memref<8x128xf32, #tpu.memory_space<vmem>>, vector<8x128xf32>,
    } else {
    }
    %c0 = arith.constant 0 : index
    %c0_1 = arith.constant 0 : index
    %3 = vector.load %arg7[%c0, %c0_1] : memref<8x128xf32, #tpu.memory_space<vmem>>, vector<8x128xf32>
    %c0_2 = arith.constant 0 : index
    %c0_3 = arith.constant 0 : index
    %4 = vector.load %arg3[%c0_2, %c0_3] : memref<8x128xbf16, #tpu.memory_space<vmem>>, vector<8x128xbf16>
    %c0_4 = arith.constant 0 : index
    %c0_5 = arith.constant 0 : index
    %5 = vector.load %arg4[%c0_4, %c0_5] : memref<128x128xbf16, #tpu.memory_space<vmem>>, vector<128x128xbf16>
    %cst = arith.constant dense<0.000000e+00> : vector<8x128xf32>
    %6 = tpu.matmul %4, %5, %cst {dimension_numbers = #tpu.dot_dimension_numbers<[1], [1], [0], [0], [0, 0, 1, 0], [], []>} : vector<8x128xbf16>, vector<128x128xbf16>, vector<8x128xf32> -> vector<8x128xf32>
    %7 = arith.addf %3, %6 : vector<8x128xf32>
    %c0_6 = arith.constant 0 : index
    %c0_7 = arith.constant 0 : index
    %8 = vector.load %arg7[%c0_6, %c0_7] : memref<8x128xf32, #tpu.memory_space<vmem>>, vector<8x128xf32>
    tpu.vector_store %arg7[%c0_6, %c0_7], %7 {strides = array<i32>} : memref<8x128xf32, #tpu.memory_space<vmem>>, vector<8x128xf32>,
    %c0_i32_8 = arith.constant 0 : i32
    %9 = arith.cmpi eq, %arg2, %c0_i32_8 : i32
    %10 = arith.extui %9 : i1 to i32
    %c0_i32_9 = arith.constant 0 : i32
    %11 = arith.cmpi ne, %10, %c0_i32_9 : i32
    scf.if %11 {
      %c0_10 = arith.constant 0 : index
      %c0_11 = arith.constant 0 : index
      %12 = vector.load %arg7[%c0_10, %c0_11] : memref<8x128xf32, #tpu.memory_space<vmem>>, vector<8x128xf32>
      %c0_12 = arith.constant 0 : index
      %c0_13 = arith.constant 0 : index
      %13 = vector.load %arg5[%c0_12, %c0_13] : memref<1x128xf32, #tpu.memory_space<vmem>>, vector<1x128xf32>
      %14 = vector.broadcast %13 : vector<1x128xf32> to vector<8x128xf32>
      %15 = arith.addf %12, %14 : vector<8x128xf32>
      %cst_14 = arith.constant 0.000000e+00 : f32
      %16 = vector.broadcast %cst_14 : f32 to vector<8x128xf32>
      %17 = arith.subf %16, %15 : vector<8x128xf32>
      %18 = math.exp %17 : vector<8x128xf32>
      %cst_15 = arith.constant 1.000000e+00 : f32
      %19 = vector.broadcast %cst_15 : f32 to vector<8x128xf32>
      %20 = arith.addf %19, %18 : vector<8x128xf32>
      %cst_16 = arith.constant 1.000000e+00 : f32
      %21 = vector.broadcast %cst_16 : f32 to vector<8x128xf32>
      %22 = arith.divf %21, %20 : vector<8x128xf32>
      %c0_17 = arith.constant 0 : index
      %c0_18 = arith.constant 0 : index
      %23 = vector.load %arg6[%c0_17, %c0_18] : memref<8x128xf32, #tpu.memory_space<vmem>>, vector<8x128xf32>
      tpu.vector_store %arg6[%c0_17, %c0_18], %22 {strides = array<i32>} : memref<8x128xf32, #tpu.memory_space<vmem>>, vector<8x128xf32>,
    } else {
    }
    return
  }
  func.func @transform_0(%arg0: i32, %arg1: i32, %arg2: i32) -> (i32, i32) {
    %c0_i32 = arith.constant 0 : i32
    return %arg0, %arg2 : i32, i32
  }
  func.func @transform_1(%arg0: i32, %arg1: i32, %arg2: i32) -> (i32, i32) {
    %c0_i32 = arith.constant 0 : i32
    return %arg1, %arg2 : i32, i32
  }
  func.func @transform_2(%arg0: i32, %arg1: i32, %arg2: i32) -> (i32, i32) {
    %c0_i32 = arith.constant 0 : i32
    %c0_i32_0 = arith.constant 0 : i32
    return %c0_i32, %arg1 : i32, i32
  }
  func.func @transform_3(%arg0: i32, %arg1: i32, %arg2: i32) -> (i32, i32) {
    %c0_i32 = arith.constant 0 : i32
    return %arg0, %arg1 : i32, i32
  }
}

</mosaic_0001>

<bundles_post_ra>
// kernel: tpu_custom_call.1
= control target key start
LH: loop header
LB: loop body
LE: loop exit
PB: predicated region body
PF: predicated region fallthrough
CT: control target
= control target key end

     0   :  { %8 = vsyncpa [#allocation4], 0  ;;  %s343_s0 = inlined_call_operand.hbm [shape: bf16[8,128], index: 0, kind: input, shape index: {}]   ;;  %s344_s1 = inlined_call_operand.hbm [shape: bf16[128,128], index: 1, kind: input, shape index: {}]   ;;  %s345_s2 = inlined_call_operand.vmem [shape: f32[1,128], index: 2, kind: input, shape index: {}]   ;;  %s346_s3 = inlined_call_operand.hbm [shape: f32[8,128], index: 3, kind: output, shape index: {}]  }
   0x1   :  { %9 = vsyncpa [#allocation7], 0 }
   0x2   :  { %10 = vsyncpa [#allocation5], 0  ;;  %s16_s14 = sshll.u32 %s343_s0, 4  ;;  %s306_s15 = smov [#allocation3]   ;;  %s17_s14 = int_to_ptr.hbm [resolvable:$true] %s16_s14 }
   0x3   :  { %s18_s16 = sshll.u32 %s306_s15, 4  ;;  %s26_s19 = sshll.u32 %s344_s1, 4  ;;  %s19_s16 = int_to_ptr.vmem [resolvable:$true] %s18_s16  ;;  %s27_s19 = int_to_ptr.hbm [resolvable:$true] %s26_s19 }
   0x4   :  { %21 = dma.hbm_to_vmem [thread:$0]  %s17_s14, 64, %s19_s16, [#allocation4]  }
   0x5   :  { %s307_s20 = smov [#allocation6]   ;;  %s308_s22 = smov 64  }
   0x6   :  { %s28_s21 = sshll.u32 %s307_s20, 4  ;;  %s309_s23 = smov 4   ;;  %s29_s21 = int_to_ptr.vmem [resolvable:$true] %s28_s21 }
   0x7   :  { %34 = dma.hbm_to_vmem [thread:$0]  %s27_s19, 1024, %s29_s21, [#allocation7], %s308_s22, %s308_s22, %s309_s23  }
   0x8   :  { %300 = dma.done.wait [#allocation4], 64  }
   0x9   :  { %301 = vsyncadd [#allocation4], 4294967232 }
   0xa   :  { %302 = dma.done.wait [#allocation7], 1024  }
   0xb   :  { %303 = vsyncadd [#allocation7], 4294966272  ;;  %v217_v0 = vld [vmem:[#allocation6 + $0x38] sm:$0xff]  ;;  %v216_v1 = vld [vmem:[#allocation6 + $0x30] sm:$0xff]  ;;  %s310_s24 = smov [#allocation8]   ;;  %s167_s27 = sshll.u32 %s346_s3, 4  ;;  %s168_s27 = int_to_ptr.hbm [resolvable:$true] %s167_s27 }
   0xc   :  { %116 = vmatpush.bf16.xpose.msra.mxu0 %v217_v0  ;;  %v215_v2 = vld [vmem:[#allocation6 + $0x28] sm:$0xff]  ;;  %v214_v3 = vld [vmem:[#allocation6 + $0x20] sm:$0xff]  ;;  %v213_v4 = vld [vmem:[#allocation6 + $0x18] sm:$0xff]  ;;  %s165_s25 = sshll.u32 %s310_s24, 4  ;;  %s166_s25 = int_to_ptr.vmem [resolvable:$true] %s165_s25 }
   0xd   :  { %v212_v5 = vld [vmem:[#allocation6 + $0x10] sm:$0xff]  ;;  %v211_v6 = vld [vmem:[#allocation6 + $0x8] sm:$0xff]  ;;  %v210_v7 = vld [vmem:[#allocation6] sm:$0xff] }
   0xe   :  { %v51_v8 = vld [vmem:[#allocation3] sm:$0xf] }
   0xf   :  { %v223_v9 = vld [vmem:[%s345_s2] ss:$0 sm:$0xff] }
  0x14   :  { %117 = vmatpush.bf16.xpose.msra.mxu0 %v216_v1 }
  0x1c   :  { %118 = vmatpush.bf16.xpose.msra.mxu0 %v215_v2 }
  0x24   :  { %119 = vmatpush.bf16.xpose.msra.mxu0 %v214_v3 }
  0x2c   :  { %120 = vmatpush.bf16.xpose.msra.mxu0 %v213_v4 }
  0x34   :  { %121 = vmatpush.bf16.xpose.msra.mxu0 %v212_v5 }
  0x3c   :  { %122 = vmatpush.bf16.xpose.msra.mxu0 %v211_v6 }
  0x44   :  { %123 = vmatpush.bf16.xpose.msra.mxu0 %v210_v7 }
  0x4b   :  { %124 = vmatmul.bf16.vlgmr.msra.gmra.mxu0 %v51_v8 }
  0xc8   :  { %v125_v10 = vpop.f32.mrf.mxu0 }
  0xc9   :  { %v139_v11 = vadd.f32 %v223_v9, %v125_v10 }
  0xcb   :  { %v140_v12 = vsub.f32 0.0, %v139_v11 }
  0xcd   :  { %v141_v13 = vmul.f32 1.442695, %v140_v12 }
  0xcf   :  { %224 = vpow2.f32 %v141_v13 }
  0xd0   :  { %v127_v14 = vpop.f32.mrf.mxu0 }
  0xd5   :  { %v225_v15 = vpop.eup %224 }
  0xd6   :  { %v143_v16 = vadd.f32 1.0, %v225_v15 }
  0xd8   :  { %226 = vrcp.f32 %v143_v16  ;;  %v155_v20 = vand.u32 2147483648, %v143_v16  ;;  %v153_v22 = vand.u32 2147483647, %v143_v16  ;;  %vm149_vm1 = vweird.f32 %v143_v16 }
  0xda   :  { %v156_v24 = vor.u32 1.1754944e-38, %v155_v20  ;;  %vm154_vm3 = vcmp.eq.f32.partialorder %v153_v22, 8.507059e+37 }
  0xde   :  { %v227_v17 = vpop.eup %226 }
  0xdf   :  { %v145_v18 = vmul.f32 %v227_v17, %v143_v16  ;;  %vm150_vm0 = vweird.f32 %v227_v17 }
  0xe0   :  { %vm151_vm2 = vmor %vm149_vm1, %vm150_vm0 }
  0xe1   :  { %v146_v19 = vsub.f32 1.0, %v145_v18 }
  0xe3   :  { %v147_v21 = vmul.f32 %v227_v17, %v146_v19 }
  0xe5   :  { %v148_v23 = vadd.f32 %v227_v17, %v147_v21 }
  0xe7   :  { %v152_v25 = vsel %vm151_vm2, %v227_v17, %v148_v23 }
  0xe8   :  { %v157_v26 = vsel %vm154_vm3, %v156_v24, %v152_v25 }
  0xe9   :  { %159 = vst [vmem:[#allocation8] sm:$0xff] %v157_v26 }
  0xea   :  { %170 = dma.vmem_to_hbm [thread:$0]  %s166_s25, 128, %s168_s27, [#allocation5]  }
  0xeb   :  { %304 = dma.done.wait [#allocation5], 128  }
  0xec   :  { %305 = vsyncadd [#allocation5], 4294967168 }
  0xed   :  { %175 = vsyncpa [#allocation4], 1 }
  0xee   :  { %176 = vsyncpa [#allocation7], 1 }
  0xef   :  { %177 = vsyncpa [#allocation5], 1 }

</bundles_post_ra>
